<compile_context>
chip_gen: v7x
topology: tpu7x:2x2x1
jax: 0.10.0
libtpu: 0.0.40
codegen_flags: <defaults>
</compile_context>

<pallas_src>
import jax
import jax.numpy as jnp
import numpy as np
from jax.experimental import pallas as pl
from jax.experimental.pallas import tpu as pltpu

_LANES = 128


def _sl1_partial_kernel(p_ref, t_ref, out_ref):
    """Partial sum of smooth-L1 (beta=1) over one lane-dense tile.

    p_ref, t_ref : (tile_rows, 128) input dtype (any float)
    out_ref      : (8, 128) float32 -- per-(sublane, lane) partial sums
    """
    diff = p_ref[...].astype(jnp.float32) - t_ref[...].astype(jnp.float32)
    ad = jnp.abs(diff)
    sl1 = jnp.where(ad < 1.0, 0.5 * diff * diff, ad - 0.5)
    r = sl1.shape[0] // 8
    # Reduce only across row-groups (VPU adds); no cross-lane XLU reduction
    # in-kernel -- the tiny (num_blocks*8, 128) partials are summed by XLA.
    out_ref[...] = jnp.sum(sl1.reshape(r, 8, _LANES), axis=0)


def _smooth_l1_sum(pred_part, targ_part, tile_rows=1024):
    """Sum of elementwise smooth-L1 over all elements of pred_part vs targ_part."""
    n = int(pred_part.size)
    rows = -(-n // _LANES)            # ceil(n / 128)
    rows8 = -(-rows // 8) * 8         # round up to sublane multiple
    tile = min(int(tile_rows), rows8)  # don't over-pad tiny inputs
    num_blocks = -(-rows8 // tile)
    padded_rows = num_blocks * tile
    pad = padded_rows * _LANES - n

    p = pred_part.reshape(-1)
    t = targ_part.reshape(-1)
    if pad:
        p = jnp.pad(p, (0, pad))      # zeros -> diff = 0 -> smooth_l1 = 0
        t = jnp.pad(t, (0, pad))
    p = p.reshape(padded_rows, _LANES)
    t = t.reshape(padded_rows, _LANES)

    partials = pl.pallas_call(
        _sl1_partial_kernel,
        out_shape=jax.ShapeDtypeStruct((num_blocks * 8, _LANES), jnp.float32),
        grid=(num_blocks,),
        in_specs=[
            pl.BlockSpec((tile, _LANES), lambda i: (i, 0)),
            pl.BlockSpec((tile, _LANES), lambda i: (i, 0)),
        ],
        out_specs=pl.BlockSpec((8, _LANES), lambda i: (i, 0)),
        compiler_params=pltpu.CompilerParams(
            dimension_semantics=("parallel",)),
    )(p, t)
    return jnp.sum(partials)


def criterion(pred, targ, sax=0.0, saq=0.0, tile_rows=1024):
    """Pallas-backed equivalent of Criterion.forward -> (loss, ploss, qloss)."""
    N, D = pred.shape
    assert D > 3, "pose dim must have >3 columns (3 translation + rotation)"

    # Lane-dense, per-part reductions (keep native dtype; upcast in-kernel).
    t_sum = _smooth_l1_sum(pred[:, :3], targ[:, :3], tile_rows)
    q_sum = _smooth_l1_sum(pred[:, 3:], targ[:, 3:], tile_rows)

    ploss = t_sum / jnp.float32(N * 3)
    qloss = q_sum / jnp.float32(N * (D - 3))

    sax = jnp.asarray(sax, jnp.float32)
    saq = jnp.asarray(saq, jnp.float32)
    loss = jnp.exp(-sax) * ploss + sax + jnp.exp(-saq) * qloss + saq
    return loss, ploss, qloss


def _criterion_ref(pred, targ, sax=0.0, saq=0.0):
    # pure-JAX reference for verification
    def sl1_mean(a, b):
        d = a.astype(jnp.float32) - b.astype(jnp.float32)
        ad = jnp.abs(d)
        return jnp.mean(jnp.where(ad < 1.0, 0.5 * d * d, ad - 0.5))

    ploss = sl1_mean(pred[:, :3], targ[:, :3])
    qloss = sl1_mean(pred[:, 3:], targ[:, 3:])
    loss = jnp.exp(-sax) * ploss + sax + jnp.exp(-saq) * qloss + saq
    return loss, ploss, qloss


if __name__ == "__main__":
    key = jax.random.PRNGKey(0)
    k1, k2 = jax.random.split(key)

    N, D = 8, 7  # batch=8, pose dim = 3 translation + 4 quaternion
    pred = jax.random.normal(k1, (N, D), dtype=jnp.float32)
    targ = jax.random.normal(k2, (N, D), dtype=jnp.float32)

    loss, ploss, qloss = criterion(pred, targ, sax=0.0, saq=0.0)
    jax.block_until_ready((loss, ploss, qloss))

    loss_r, ploss_r, qloss_r = _criterion_ref(pred, targ)
    np.testing.assert_allclose(np.asarray(loss), np.asarray(loss_r), rtol=1e-5, atol=1e-5)
    np.testing.assert_allclose(np.asarray(ploss), np.asarray(ploss_r), rtol=1e-5, atol=1e-5)
    np.testing.assert_allclose(np.asarray(qloss), np.asarray(qloss_r), rtol=1e-5, atol=1e-5)

    print("KERNEL_OK")
</pallas_src>

<mosaic_0001>
module attributes {stable_mosaic.version = 11 : i64} {
  func.func @_sl1_partial_kernel(%arg0: i32, %arg1: memref<8x128xf32, #tpu.memory_space<vmem>>, %arg2: memref<8x128xf32, #tpu.memory_space<vmem>>, %arg3: memref<8x128xf32, #tpu.memory_space<vmem>>) attributes {dimension_semantics = [#tpu.dimension_semantics<parallel>], iteration_bounds = array<i64: 1>, scalar_prefetch = 0 : i64, scratch_operands = 0 : i64, tpu.core_type = #tpu.core_type<tc>, window_params = [{transform_indices = @transform_0, window_bounds = array<i64: 8, 128>}, {transform_indices = @transform_1, window_bounds = array<i64: 8, 128>}, {transform_indices = @transform_2, window_bounds = array<i64: 8, 128>}]} {
    %c0 = arith.constant 0 : index
    %c0_0 = arith.constant 0 : index
    %0 = vector.load %arg1[%c0, %c0_0] : memref<8x128xf32, #tpu.memory_space<vmem>>, vector<8x128xf32>
    %c0_1 = arith.constant 0 : index
    %c0_2 = arith.constant 0 : index
    %1 = vector.load %arg2[%c0_1, %c0_2] : memref<8x128xf32, #tpu.memory_space<vmem>>, vector<8x128xf32>
    %2 = arith.subf %0, %1 : vector<8x128xf32>
    %3 = math.absf %2 : vector<8x128xf32>
    %cst = arith.constant 1.000000e+00 : f32
    %4 = vector.broadcast %cst : f32 to vector<8x128xf32>
    %5 = arith.cmpf olt, %3, %4 : vector<8x128xf32>
    %cst_3 = arith.constant 5.000000e-01 : f32
    %6 = vector.broadcast %cst_3 : f32 to vector<8x128xf32>
    %7 = arith.mulf %6, %2 : vector<8x128xf32>
    %8 = arith.mulf %7, %2 : vector<8x128xf32>
    %cst_4 = arith.constant 5.000000e-01 : f32
    %9 = vector.broadcast %cst_4 : f32 to vector<8x128xf32>
    %10 = arith.subf %3, %9 : vector<8x128xf32>
    %11 = arith.select %5, %8, %10 : vector<8x128xi1>, vector<8x128xf32>
    %12 = vector.shape_cast %11 : vector<8x128xf32> to vector<1x8x128xf32>
    %cst_5 = arith.constant dense<0.000000e+00> : vector<8x128xf32>
    %13 = vector.multi_reduction <add>, %12, %cst_5 [0] : vector<1x8x128xf32> to vector<8x128xf32>
    %c0_6 = arith.constant 0 : index
    %c0_7 = arith.constant 0 : index
    %14 = vector.load %arg3[%c0_6, %c0_7] : memref<8x128xf32, #tpu.memory_space<vmem>>, vector<8x128xf32>
    tpu.vector_store %arg3[%c0_6, %c0_7], %13 {strides = array<i32>} : memref<8x128xf32, #tpu.memory_space<vmem>>, vector<8x128xf32>,
    return
  }
  func.func @transform_0(%arg0: i32) -> (i32, i32) {
    %c0_i32 = arith.constant 0 : i32
    %c0_i32_0 = arith.constant 0 : i32
    return %arg0, %c0_i32 : i32, i32
  }
  func.func @transform_1(%arg0: i32) -> (i32, i32) {
    %c0_i32 = arith.constant 0 : i32
    %c0_i32_0 = arith.constant 0 : i32
    return %arg0, %c0_i32 : i32, i32
  }
  func.func @transform_2(%arg0: i32) -> (i32, i32) {
    %c0_i32 = arith.constant 0 : i32
    %c0_i32_0 = arith.constant 0 : i32
    return %arg0, %c0_i32 : i32, i32
  }
}

</mosaic_0001>

<bundles_post_ra>
// kernel: tpu_custom_call.1
= control target key start
LH: loop header
LB: loop body
LE: loop exit
PB: predicated region body
PF: predicated region fallthrough
CT: control target
= control target key end

     0   :  { %7 = vsyncpa [#allocation3], 0  ;;  %s193_s0 = inlined_call_operand.hbm [shape: f32[8,128], index: 0, kind: input, shape index: {}]   ;;  %s194_s1 = inlined_call_operand.hbm [shape: f32[8,128], index: 1, kind: input, shape index: {}]   ;;  %s195_s2 = inlined_call_operand.hbm [shape: f32[8,128], index: 2, kind: output, shape index: {}]  }
   0x1   :  { %8 = vsyncpa [#allocation6], 0 }
   0x2   :  { %9 = vsyncpa [#allocation4], 0  ;;  %s139_s9 = smov [#allocation2]   ;;  %s140_s11 = smov [#allocation5]  }
   0x3   :  { %s16_s10 = sshll.u32 %s139_s9, 4  ;;  %s26_s12 = sshll.u32 %s140_s11, 4  ;;  %s17_s10 = int_to_ptr.vmem [resolvable:$true] %s16_s10  ;;  %s27_s12 = int_to_ptr.vmem [resolvable:$true] %s26_s12 }
   0x4   :  { %s67_s15 = scalar_lea.hbm %s193_s0, 128 }
   0x5   :  { %p68_p0 = scmp.ne.s32.totalorder %s193_s0, %s67_s15  ;;  %p71_p1 = scmp.lt.u32.totalorder %s67_s15, %s193_s0 }
   0x7   :  { %p73_p2 = pnand %p71_p1, %p68_p0 }
   0x9   :  { %76 = shalt.err (!%p73_p2)
}
   0xa   :  { %s77_s20 = scalar_lea.vmem %s17_s10, 128  ;;  %p82_p4 = scmp.lt.s32.totalorder %s17_s10, %s17_s10 }
   0xb   :  { %p78_p3 = scmp.ne.s32.totalorder %s17_s10, %s77_s20  ;;  %p83_p5 = scmp.lt.s32.totalorder %s77_s20, %s77_s20 }
   0xd   :  { %p84_p6 = por %p83_p5, %p82_p4 }
   0xf   :  { %p85_p7 = pnand %p84_p6, %p78_p3 }
  0x11   :  { %88 = shalt.err (!%p85_p7)
}
  0x12   :  { %19 = dma.hbm_to_vmem [thread:$0]  %s193_s0, 128, %s17_s10, [#allocation3]  }
  0x13   :  { %s89_s25 = scalar_lea.hbm %s194_s1, 128 }
  0x14   :  { %p90_p8 = scmp.ne.s32.totalorder %s194_s1, %s89_s25  ;;  %p93_p9 = scmp.lt.u32.totalorder %s89_s25, %s194_s1 }
  0x16   :  { %p95_p10 = pnand %p93_p9, %p90_p8 }
  0x18   :  { %98 = shalt.err (!%p95_p10)
}
  0x19   :  { %s99_s30 = scalar_lea.vmem %s27_s12, 128  ;;  %p104_p12 = scmp.lt.s32.totalorder %s27_s12, %s27_s12 }
  0x1a   :  { %p100_p11 = scmp.ne.s32.totalorder %s27_s12, %s99_s30  ;;  %p105_p13 = scmp.lt.s32.totalorder %s99_s30, %s99_s30 }
  0x1c   :  { %p106_p0 = por %p105_p13, %p104_p12 }
  0x1e   :  { %p107_p1 = pnand %p106_p0, %p100_p11 }
  0x20   :  { %110 = shalt.err (!%p107_p1)
}
  0x21   :  { %29 = dma.hbm_to_vmem [thread:$0]  %s194_s1, 128, %s27_s12, [#allocation6]  }
  0x22   :  { %133 = dma.done.wait [#allocation3], 128  }
  0x23   :  { %134 = vsyncadd [#allocation3], 4294967168 }
  0x24   :  { %135 = dma.done.wait [#allocation6], 128  }
  0x25   :  { %136 = vsyncadd [#allocation6], 4294967168  ;;  %v36_v0 = vld [vmem:[#allocation2] sm:$0xff]  ;;  %v37_v1 = vld [vmem:[#allocation5] sm:$0xff]  ;;  %s141_s4 = smov [#allocation7]  }
  0x26   :  { %v38_v2 = vsub.f32 %v36_v0, %v37_v1  ;;  %s53_s5 = sshll.u32 %s141_s4, 4  ;;  %s54_s5 = int_to_ptr.vmem [resolvable:$true] %s53_s5 }
  0x27   :  { %s111_s6 = scalar_lea.vmem %s54_s5, 128  ;;  %p116_p3 = scmp.lt.s32.totalorder %s54_s5, %s54_s5 }
  0x28   :  { %v39_v3 = vand.u32 2147483647, %v38_v2  ;;  %v41_v4 = vmul.f32 0.5, %v38_v2  ;;  %p112_p2 = scmp.ne.s32.totalorder %s54_s5, %s111_s6  ;;  %p117_p4 = scmp.lt.s32.totalorder %s111_s6, %s111_s6 }
  0x2a   :  { %vm40_vm0 = vcmp.lt.f32.partialorder %v39_v3, 1.0  ;;  %v42_v5 = vmul.f32 %v41_v4, %v38_v2  ;;  %v63_v6 = vadd.f32 -0.5, %v39_v3  ;;  %p118_p5 = por %p117_p4, %p116_p3 }
  0x2c   :  { %v44_v7 = vsel %vm40_vm0, %v42_v5, %v63_v6  ;;  %p119_p6 = pnand %p118_p5, %p112_p2 }
  0x2d   :  { %46 = vst [vmem:[#allocation7] sm:$0xff] %v44_v7 }
  0x2e   :  { %122 = shalt.err (!%p119_p6)
}
  0x2f   :  { %s123_s8 = scalar_lea.hbm %s195_s2, 128 }
  0x30   :  { %p124_p7 = scmp.ne.s32.totalorder %s195_s2, %s123_s8  ;;  %p127_p8 = scmp.lt.u32.totalorder %s123_s8, %s195_s2 }
  0x32   :  { %p129_p9 = pnand %p127_p8, %p124_p7 }
  0x34   :  { %132 = shalt.err (!%p129_p9)
}
  0x35   :  { %56 = dma.vmem_to_hbm [thread:$0]  %s54_s5, 128, %s195_s2, [#allocation4]  }
  0x36   :  { %137 = dma.done.wait [#allocation4], 128  }
  0x37   :  { %138 = vsyncadd [#allocation4], 4294967168 }
  0x38   :  { %60 = vsyncpa [#allocation3], 1 }
  0x39   :  { %61 = vsyncpa [#allocation6], 1 }
  0x3a   :  { %62 = vsyncpa [#allocation4], 1 }

</bundles_post_ra>
